<compile_context>
chip_gen: v5e
topology: v5e:2x2
jax: 0.10.0
libtpu: 0.0.40
codegen_flags: <defaults>
</compile_context>

<pallas_src>
import jax
import jax.numpy as jnp
from jax import lax
from jax.experimental import pallas as pl
from jax.experimental.pallas import tpu as pltpu


def _leaky_relu(x, negative_slope=0.01):
    # torch.nn.functional.leaky_relu default negative_slope = 0.01
    return jnp.where(x > 0, x, negative_slope * x)


def _qfunc_kernel(a_ref, h_ref,
                  ew0_ref, eb0_ref,
                  wf_ref, bf_ref, wh_ref,
                  vw1_ref, vb1_ref, vw2_ref, vb2_ref,
                  vw3_ref, vb3_ref,
                  out_ref):
    f32 = jnp.float32
    cdt = ew0_ref.dtype            # compute dtype (f32 or bf16); accumulation stays f32

    # Streamed activations arrive batch-major (TB, feat); cast on the VPU (free relative
    # to the MXU work, and cheaper than a separate wrapper-side cast pass over HBM).
    a = a_ref[...].astype(cdt)     # (TB, act_dim)
    h = h_ref[...].astype(cdt)     # (TB, repr_dim)

    # Contract the feature axis of BOTH operands (q @ k^T style): result is feature-major
    # [out, TB] with the batch on the lane axis — no explicit transpose op anywhere.
    dn = (((1,), (1,)), ((), ()))

    # ---- embed_actions hidden layer: leaky(W0 @ a^T + b0) ------------------
    eh = lax.dot_general(ew0_ref[...], a, dn, preferred_element_type=f32) + eb0_ref[...]
    eh = _leaky_relu(eh).astype(cdt)                      # (emb_hidden, TB)

    # ---- predictor layer 0: embedding output layer folded in, concat fused --
    x = (jnp.dot(wf_ref[...], eh, preferred_element_type=f32)
         + lax.dot_general(wh_ref[...], h, dn, preferred_element_type=f32)
         + bf_ref[...])
    x = _leaky_relu(x).astype(cdt)                        # (pred_hidden, TB)

    x = jnp.dot(vw1_ref[...], x, preferred_element_type=f32) + vb1_ref[...]
    x = _leaky_relu(x).astype(cdt)

    x = jnp.dot(vw2_ref[...], x, preferred_element_type=f32) + vb2_ref[...]
    x = _leaky_relu(x).astype(cdt)

    val = jnp.dot(vw3_ref[...], x, preferred_element_type=f32) + vb3_ref[...]
    out_ref[...] = val.astype(out_ref.dtype)              # (1, TB) lane-dense store


def _round_up(x, m):
    return ((x + m - 1) // m) * m


def qfunction_forward(a_t, h_t, params, act_embedding_dim, *,
                      block_batch=4096, compute_dtype=jnp.float32):
    """Forward pass of QfunctionApproximator.

    a_t: (batch, act_dim) f32, h_t: (batch, repr_dim) f32 — consumed in native layout.
    params: torch-layout params (w: [out, in], b: [out, 1]). Returns (batch, 1) f32.
    compute_dtype=jnp.bfloat16 is recommended on v5e/v6e/v7x (MXU-native); accumulation,
    bias adds and leaky_relu stay f32 either way.
    """
    (ew0, eb0, ew1, eb1, vw0, vb0, vw1, vb1, vw2, vb2, vw3, vb3) = params
    batch, act_dim = a_t.shape
    repr_dim = h_t.shape[1]
    emb_hidden = ew0.shape[0]
    pred_hidden = vw0.shape[0]

    # ---- wrapper-side algebraic folding & weight split (exact, tiny, done once) ----
    vw0_e = vw0[:, :act_embedding_dim]            # (pred_hidden, act_emb)
    vw0_h = vw0[:, act_embedding_dim:]            # (pred_hidden, repr_dim)
    w_fused = vw0_e @ ew1                         # (pred_hidden, emb_hidden)
    b_fused = vb0 + vw0_e @ eb1                   # (pred_hidden, 1)

    # ---- padding-aware batch tiling -----------------------------------------------
    tb_max = max(_round_up(block_batch, 128), 128)
    n_tiles = pl.cdiv(batch, tb_max)
    if batch >= 1024:
        # Keep >=2 grid steps so the "parallel" axis can shard across v7x's 2 TCs
        # (no-op cost on v5e/v6e: one extra ~0.35us grid step at most).
        n_tiles = max(n_tiles, 2)
    TB = _round_up(pl.cdiv(batch, n_tiles), 128)   # near-equal 128-multiple tiles
    b_pad = n_tiles * TB                           # overshoot < 128 rows per tile

    # Only pad when the batch is ragged (static Python branch; no op for aligned batches).
    if b_pad != batch:
        a_in = jnp.pad(a_t, ((0, b_pad - batch), (0, 0)))
        h_in = jnp.pad(h_t, ((0, b_pad - batch), (0, 0)))
    else:
        a_in, h_in = a_t, h_t

    # Weights in compute dtype (bf16 halves weight DMA and runs the MXU natively on all
    # generations, including v5e); biases stay f32.
    ew0c, wfc, whc, vw1c, vw2c, vw3c = (
        w.astype(compute_dtype) for w in (ew0, w_fused, vw0_h, vw1, vw2, vw3))
    eb0c, bfc, vb1c, vb2c, vb3c = (
        b.astype(jnp.float32) for b in (eb0, b_fused, vb1, vb2, vb3))

    operands = (a_in, h_in, ew0c, eb0c, wfc, bfc, whc,
                vw1c, vb1c, vw2c, vb2c, vw3c, vb3c)

    def streamed(feat):   # batch-tiled, default depth-2 pipelining (DMA never exposed)
        return pl.BlockSpec((TB, feat), lambda i: (i, 0))

    def resident(arr):    # full-shape block, constant index -> stays in VMEM across steps
        return pl.BlockSpec(arr.shape, lambda i: (0, 0))

    in_specs = [streamed(act_dim), streamed(repr_dim)] + [resident(x) for x in operands[2:]]

    flops = 2 * b_pad * (emb_hidden * act_dim
                         + pred_hidden * (emb_hidden + repr_dim)
                         + 2 * pred_hidden * pred_hidden
                         + pred_hidden)
    bytes_accessed = sum(int(x.size) * x.dtype.itemsize for x in operands) + b_pad * 4

    out = pl.pallas_call(
        _qfunc_kernel,
        out_shape=jax.ShapeDtypeStruct((1, b_pad), jnp.float32),
        grid=(n_tiles,),
        in_specs=in_specs,
        out_specs=pl.BlockSpec((1, TB), lambda i: (0, i)),
        compiler_params=pltpu.CompilerParams(
            dimension_semantics=("parallel",),          # megacore sharding on v7x
            vmem_limit_bytes=32 * 1024 * 1024),          # few-MiB footprint; fits all gens
        cost_estimate=pl.CostEstimate(flops=flops, transcendentals=0,
                                      bytes_accessed=bytes_accessed),
    )(*operands)

    return out[:, :batch].reshape(batch, 1)


def init_linear(key, in_d, out_d):
    """torch.nn.Linear-style init: uniform(-1/sqrt(in), 1/sqrt(in)).
    Weight in torch layout [out_d, in_d]; bias as a column [out_d, 1]."""
    kw, kb = jax.random.split(key)
    bound = 1.0 / jnp.sqrt(float(in_d))
    w = jax.random.uniform(kw, (out_d, in_d), jnp.float32, -bound, bound)
    b = jax.random.uniform(kb, (out_d, 1), jnp.float32, -bound, bound)
    return w, b


def init_qfunction_params(key, repr_dim, act_dim, act_embedding_dim):
    emb_hidden = act_embedding_dim * 2
    pred_in = repr_dim + act_embedding_dim
    pred_hidden = pred_in * 2

    keys = jax.random.split(key, 6)
    ew0, eb0 = init_linear(keys[0], act_dim, emb_hidden)
    ew1, eb1 = init_linear(keys[1], emb_hidden, act_embedding_dim)
    vw0, vb0 = init_linear(keys[2], pred_in, pred_hidden)
    vw1, vb1 = init_linear(keys[3], pred_hidden, pred_hidden)
    vw2, vb2 = init_linear(keys[4], pred_hidden, pred_hidden)
    vw3, vb3 = init_linear(keys[5], pred_hidden, 1)
    return (ew0, eb0, ew1, eb1, vw0, vb0, vw1, vb1, vw2, vb2, vw3, vb3)


def reference_forward(a_t, h_t, params):
    (ew0, eb0, ew1, eb1, vw0, vb0, vw1, vb1, vw2, vb2, vw3, vb3) = params
    e = _leaky_relu(a_t @ ew0.T + eb0.T)
    e = e @ ew1.T + eb1.T
    x = jnp.concatenate([e, h_t], axis=1)
    x = _leaky_relu(x @ vw0.T + vb0.T)
    x = _leaky_relu(x @ vw1.T + vb1.T)
    x = _leaky_relu(x @ vw2.T + vb2.T)
    return x @ vw3.T + vb3.T


if __name__ == "__main__":
    # Small shapes consistent with forward(a_t, h_t); batch=200 exercises tail padding
    # (200 -> 256) and, with block_batch=128, a multi-step grid with resident weights.
    batch = 200
    repr_dim = 16
    act_dim = 6
    act_embedding_dim = 8

    key = jax.random.PRNGKey(0)
    k_a, k_h, k_p = jax.random.split(key, 3)
    a_t = jax.random.normal(k_a, (batch, act_dim), jnp.float32)
    h_t = jax.random.normal(k_h, (batch, repr_dim), jnp.float32)
    params = init_qfunction_params(k_p, repr_dim, act_dim, act_embedding_dim)

    ref = reference_forward(a_t, h_t, params)

    # f32, default (large) tile: single grid step, no wrapper-side transpose/cast.
    v1 = jax.block_until_ready(qfunction_forward(a_t, h_t, params, act_embedding_dim))
    assert v1.shape == (batch, 1)
    assert jnp.allclose(v1, ref, atol=1e-3, rtol=1e-3)

    # f32, small tile: exercises the multi-step grid, VMEM-resident weights across steps,
    # and padding-aware tile selection.
    v2 = jax.block_until_ready(
        qfunction_forward(a_t, h_t, params, act_embedding_dim, block_batch=128))
    assert v2.shape == (batch, 1)
    assert jnp.allclose(v2, ref, atol=1e-3, rtol=1e-3)

    # bf16 compute path (recommended on v5e/v6e/v7x): f32 accumulation / bias / leaky_relu.
    # Checked numerically against the f32 reference (not just isfinite).
    v3 = jax.block_until_ready(
        qfunction_forward(a_t, h_t, params, act_embedding_dim,
                          compute_dtype=jnp.bfloat16))
    assert v3.shape == (batch, 1)
    assert jnp.allclose(v3, ref, atol=5e-2, rtol=5e-2)

    print("KERNEL_OK")
</pallas_src>

<mosaic_0001>
module attributes {stable_mosaic.version = 11 : i64} {
  func.func @_qfunc_kernel(%arg0: i32, %arg1: memref<256x6xf32, #tpu.memory_space<vmem>>, %arg2: memref<256x16xf32, #tpu.memory_space<vmem>>, %arg3: memref<16x6xf32, #tpu.memory_space<vmem>>, %arg4: memref<16x1xf32, #tpu.memory_space<vmem>>, %arg5: memref<48x16xf32, #tpu.memory_space<vmem>>, %arg6: memref<48x1xf32, #tpu.memory_space<vmem>>, %arg7: memref<48x16xf32, #tpu.memory_space<vmem>>, %arg8: memref<48x48xf32, #tpu.memory_space<vmem>>, %arg9: memref<48x1xf32, #tpu.memory_space<vmem>>, %arg10: memref<48x48xf32, #tpu.memory_space<vmem>>, %arg11: memref<48x1xf32, #tpu.memory_space<vmem>>, %arg12: memref<1x48xf32, #tpu.memory_space<vmem>>, %arg13: memref<1x1xf32, #tpu.memory_space<vmem>>, %arg14: memref<1x256xf32, #tpu.memory_space<vmem>>) attributes {dimension_semantics = [#tpu.dimension_semantics<parallel>], iteration_bounds = array<i64: 1>, scalar_prefetch = 0 : i64, scratch_operands = 0 : i64, tpu.core_type = #tpu.core_type<tc>, window_params = [{transform_indices = @transform_0, window_bounds = array<i64: 256, 6>}, {transform_indices = @transform_1, window_bounds = array<i64: 256, 16>}, {pipeline_mode = #tpu.pipeline_mode<synchronous>, transform_indices = @transform_2, window_bounds = array<i64: 16, 6>}, {pipeline_mode = #tpu.pipeline_mode<synchronous>, transform_indices = @transform_3, window_bounds = array<i64: 16, 1>}, {pipeline_mode = #tpu.pipeline_mode<synchronous>, transform_indices = @transform_4, window_bounds = array<i64: 48, 16>}, {pipeline_mode = #tpu.pipeline_mode<synchronous>, transform_indices = @transform_5, window_bounds = array<i64: 48, 1>}, {pipeline_mode = #tpu.pipeline_mode<synchronous>, transform_indices = @transform_6, window_bounds = array<i64: 48, 16>}, {pipeline_mode = #tpu.pipeline_mode<synchronous>, transform_indices = @transform_7, window_bounds = array<i64: 48, 48>}, {pipeline_mode = #tpu.pipeline_mode<synchronous>, transform_indices = @transform_8, window_bounds = array<i64: 48, 1>}, {pipeline_mode = #tpu.pipeline_mode<synchronous>, transform_indices = @transform_9, window_bounds = array<i64: 48, 48>}, {pipeline_mode = #tpu.pipeline_mode<synchronous>, transform_indices = @transform_10, window_bounds = array<i64: 48, 1>}, {pipeline_mode = #tpu.pipeline_mode<synchronous>, transform_indices = @transform_11, window_bounds = array<i64: 1, 48>}, {pipeline_mode = #tpu.pipeline_mode<synchronous>, transform_indices = @transform_12, window_bounds = array<i64: 1, 1>}, {transform_indices = @transform_13, window_bounds = array<i64: 1, 256>}]} {
    %c0 = arith.constant 0 : index
    %c0_0 = arith.constant 0 : index
    %0 = vector.load %arg1[%c0, %c0_0] : memref<256x6xf32, #tpu.memory_space<vmem>>, vector<256x6xf32>
    %c0_1 = arith.constant 0 : index
    %c0_2 = arith.constant 0 : index
    %1 = vector.load %arg2[%c0_1, %c0_2] : memref<256x16xf32, #tpu.memory_space<vmem>>, vector<256x16xf32>
    %c0_3 = arith.constant 0 : index
    %c0_4 = arith.constant 0 : index
    %2 = vector.load %arg3[%c0_3, %c0_4] : memref<16x6xf32, #tpu.memory_space<vmem>>, vector<16x6xf32>
    %cst = arith.constant dense<0.000000e+00> : vector<16x256xf32>
    %3 = tpu.matmul %2, %0, %cst {dimension_numbers = #tpu.dot_dimension_numbers<[1], [1], [0], [0], [0, 0, 1, 0], [], []>} : vector<16x6xf32>, vector<256x6xf32>, vector<16x256xf32> -> vector<16x256xf32>
    %c0_5 = arith.constant 0 : index
    %c0_6 = arith.constant 0 : index
    %4 = vector.load %arg4[%c0_5, %c0_6] : memref<16x1xf32, #tpu.memory_space<vmem>>, vector<16x1xf32>
    %5 = vector.broadcast %4 : vector<16x1xf32> to vector<16x256xf32>
    %6 = arith.addf %3, %5 : vector<16x256xf32>
    %cst_7 = arith.constant 0.000000e+00 : f32
    %7 = vector.broadcast %cst_7 : f32 to vector<16x256xf32>
    %8 = arith.cmpf ogt, %6, %7 : vector<16x256xf32>
    %cst_8 = arith.constant 0.00999999977 : f32
    %9 = vector.broadcast %cst_8 : f32 to vector<16x256xf32>
    %10 = arith.mulf %9, %6 : vector<16x256xf32>
    %11 = arith.select %8, %6, %10 : vector<16x256xi1>, vector<16x256xf32>
    %c0_9 = arith.constant 0 : index
    %c0_10 = arith.constant 0 : index
    %12 = vector.load %arg5[%c0_9, %c0_10] : memref<48x16xf32, #tpu.memory_space<vmem>>, vector<48x16xf32>
    %cst_11 = arith.constant dense<0.000000e+00> : vector<48x256xf32>
    %13 = tpu.matmul %12, %11, %cst_11 {dimension_numbers = #tpu.dot_dimension_numbers<[1], [0], [0], [1], [0, 0, 1, 1], [], []>} : vector<48x16xf32>, vector<16x256xf32>, vector<48x256xf32> -> vector<48x256xf32>
    %c0_12 = arith.constant 0 : index
    %c0_13 = arith.constant 0 : index
    %14 = vector.load %arg7[%c0_12, %c0_13] : memref<48x16xf32, #tpu.memory_space<vmem>>, vector<48x16xf32>
    %cst_14 = arith.constant dense<0.000000e+00> : vector<48x256xf32>
    %15 = tpu.matmul %14, %1, %cst_14 {dimension_numbers = #tpu.dot_dimension_numbers<[1], [1], [0], [0], [0, 0, 1, 0], [], []>} : vector<48x16xf32>, vector<256x16xf32>, vector<48x256xf32> -> vector<48x256xf32>
    %16 = arith.addf %13, %15 : vector<48x256xf32>
    %c0_15 = arith.constant 0 : index
    %c0_16 = arith.constant 0 : index
    %17 = vector.load %arg6[%c0_15, %c0_16] : memref<48x1xf32, #tpu.memory_space<vmem>>, vector<48x1xf32>
    %18 = vector.broadcast %17 : vector<48x1xf32> to vector<48x256xf32>
    %19 = arith.addf %16, %18 : vector<48x256xf32>
    %cst_17 = arith.constant 0.000000e+00 : f32
    %20 = vector.broadcast %cst_17 : f32 to vector<48x256xf32>
    %21 = arith.cmpf ogt, %19, %20 : vector<48x256xf32>
    %cst_18 = arith.constant 0.00999999977 : f32
    %22 = vector.broadcast %cst_18 : f32 to vector<48x256xf32>
    %23 = arith.mulf %22, %19 : vector<48x256xf32>
    %24 = arith.select %21, %19, %23 : vector<48x256xi1>, vector<48x256xf32>
    %c0_19 = arith.constant 0 : index
    %c0_20 = arith.constant 0 : index
    %25 = vector.load %arg8[%c0_19, %c0_20] : memref<48x48xf32, #tpu.memory_space<vmem>>, vector<48x48xf32>
    %cst_21 = arith.constant dense<0.000000e+00> : vector<48x256xf32>
    %26 = tpu.matmul %25, %24, %cst_21 {dimension_numbers = #tpu.dot_dimension_numbers<[1], [0], [0], [1], [0, 0, 1, 1], [], []>} : vector<48x48xf32>, vector<48x256xf32>, vector<48x256xf32> -> vector<48x256xf32>
    %c0_22 = arith.constant 0 : index
    %c0_23 = arith.constant 0 : index
    %27 = vector.load %arg9[%c0_22, %c0_23] : memref<48x1xf32, #tpu.memory_space<vmem>>, vector<48x1xf32>
    %28 = vector.broadcast %27 : vector<48x1xf32> to vector<48x256xf32>
    %29 = arith.addf %26, %28 : vector<48x256xf32>
    %cst_24 = arith.constant 0.000000e+00 : f32
    %30 = vector.broadcast %cst_24 : f32 to vector<48x256xf32>
    %31 = arith.cmpf ogt, %29, %30 : vector<48x256xf32>
    %cst_25 = arith.constant 0.00999999977 : f32
    %32 = vector.broadcast %cst_25 : f32 to vector<48x256xf32>
    %33 = arith.mulf %32, %29 : vector<48x256xf32>
    %34 = arith.select %31, %29, %33 : vector<48x256xi1>, vector<48x256xf32>
    %c0_26 = arith.constant 0 : index
    %c0_27 = arith.constant 0 : index
    %35 = vector.load %arg10[%c0_26, %c0_27] : memref<48x48xf32, #tpu.memory_space<vmem>>, vector<48x48xf32>
    %cst_28 = arith.constant dense<0.000000e+00> : vector<48x256xf32>
    %36 = tpu.matmul %35, %34, %cst_28 {dimension_numbers = #tpu.dot_dimension_numbers<[1], [0], [0], [1], [0, 0, 1, 1], [], []>} : vector<48x48xf32>, vector<48x256xf32>, vector<48x256xf32> -> vector<48x256xf32>
    %c0_29 = arith.constant 0 : index
    %c0_30 = arith.constant 0 : index
    %37 = vector.load %arg11[%c0_29, %c0_30] : memref<48x1xf32, #tpu.memory_space<vmem>>, vector<48x1xf32>
    %38 = vector.broadcast %37 : vector<48x1xf32> to vector<48x256xf32>
    %39 = arith.addf %36, %38 : vector<48x256xf32>
    %cst_31 = arith.constant 0.000000e+00 : f32
    %40 = vector.broadcast %cst_31 : f32 to vector<48x256xf32>
    %41 = arith.cmpf ogt, %39, %40 : vector<48x256xf32>
    %cst_32 = arith.constant 0.00999999977 : f32
    %42 = vector.broadcast %cst_32 : f32 to vector<48x256xf32>
    %43 = arith.mulf %42, %39 : vector<48x256xf32>
    %44 = arith.select %41, %39, %43 : vector<48x256xi1>, vector<48x256xf32>
    %c0_33 = arith.constant 0 : index
    %c0_34 = arith.constant 0 : index
    %45 = vector.load %arg12[%c0_33, %c0_34] : memref<1x48xf32, #tpu.memory_space<vmem>>, vector<1x48xf32>
    %cst_35 = arith.constant dense<0.000000e+00> : vector<1x256xf32>
    %46 = tpu.matmul %45, %44, %cst_35 {dimension_numbers = #tpu.dot_dimension_numbers<[1], [0], [0], [1], [0, 0, 1, 1], [], []>} : vector<1x48xf32>, vector<48x256xf32>, vector<1x256xf32> -> vector<1x256xf32>
    %c0_36 = arith.constant 0 : index
    %c0_37 = arith.constant 0 : index
    %47 = vector.load %arg13[%c0_36, %c0_37] : memref<1x1xf32, #tpu.memory_space<vmem>>, vector<1x1xf32>
    %48 = vector.broadcast %47 : vector<1x1xf32> to vector<1x256xf32>
    %49 = arith.addf %46, %48 : vector<1x256xf32>
    %c0_38 = arith.constant 0 : index
    %c0_39 = arith.constant 0 : index
    %50 = vector.load %arg14[%c0_38, %c0_39] : memref<1x256xf32, #tpu.memory_space<vmem>>, vector<1x256xf32>
    tpu.vector_store %arg14[%c0_38, %c0_39], %49 {strides = array<i32>} : memref<1x256xf32, #tpu.memory_space<vmem>>, vector<1x256xf32>,
    return
  }
  func.func @transform_0(%arg0: i32) -> (i32, i32) {
    %c0_i32 = arith.constant 0 : i32
    %c0_i32_0 = arith.constant 0 : i32
    return %arg0, %c0_i32 : i32, i32
  }
  func.func @transform_1(%arg0: i32) -> (i32, i32) {
    %c0_i32 = arith.constant 0 : i32
    %c0_i32_0 = arith.constant 0 : i32
    return %arg0, %c0_i32 : i32, i32
  }
  func.func @transform_2(%arg0: i32) -> (i32, i32) {
    %c0_i32 = arith.constant 0 : i32
    %c0_i32_0 = arith.constant 0 : i32
    %c0_i32_1 = arith.constant 0 : i32
    return %c0_i32, %c0_i32_0 : i32, i32
  }
  func.func @transform_3(%arg0: i32) -> (i32, i32) {
    %c0_i32 = arith.constant 0 : i32
    %c0_i32_0 = arith.constant 0 : i32
    %c0_i32_1 = arith.constant 0 : i32
    return %c0_i32, %c0_i32_0 : i32, i32
  }
  func.func @transform_4(%arg0: i32) -> (i32, i32) {
    %c0_i32 = arith.constant 0 : i32
    %c0_i32_0 = arith.constant 0 : i32
    %c0_i32_1 = arith.constant 0 : i32
    return %c0_i32, %c0_i32_0 : i32, i32
  }
  func.func @transform_5(%arg0: i32) -> (i32, i32) {
    %c0_i32 = arith.constant 0 : i32
    %c0_i32_0 = arith.constant 0 : i32
    %c0_i32_1 = arith.constant 0 : i32
    return %c0_i32, %c0_i32_0 : i32, i32
  }
  func.func @transform_6(%arg0: i32) -> (i32, i32) {
    %c0_i32 = arith.constant 0 : i32
    %c0_i32_0 = arith.constant 0 : i32
    %c0_i32_1 = arith.constant 0 : i32
    return %c0_i32, %c0_i32_0 : i32, i32
  }
  func.func @transform_7(%arg0: i32) -> (i32, i32) {
    %c0_i32 = arith.constant 0 : i32
    %c0_i32_0 = arith.constant 0 : i32
    %c0_i32_1 = arith.constant 0 : i32
    return %c0_i32, %c0_i32_0 : i32, i32
  }
  func.func @transform_8(%arg0: i32) -> (i32, i32) {
    %c0_i32 = arith.constant 0 : i32
    %c0_i32_0 = arith.constant 0 : i32
    %c0_i32_1 = arith.constant 0 : i32
    return %c0_i32, %c0_i32_0 : i32, i32
  }
  func.func @transform_9(%arg0: i32) -> (i32, i32) {
    %c0_i32 = arith.constant 0 : i32
    %c0_i32_0 = arith.constant 0 : i32
    %c0_i32_1 = arith.constant 0 : i32
    return %c0_i32, %c0_i32_0 : i32, i32
  }
  func.func @transform_10(%arg0: i32) -> (i32, i32) {
    %c0_i32 = arith.constant 0 : i32
    %c0_i32_0 = arith.constant 0 : i32
    %c0_i32_1 = arith.constant 0 : i32
    return %c0_i32, %c0_i32_0 : i32, i32
  }
  func.func @transform_11(%arg0: i32) -> (i32, i32) {
    %c0_i32 = arith.constant 0 : i32
    %c0_i32_0 = arith.constant 0 : i32
    %c0_i32_1 = arith.constant 0 : i32
    return %c0_i32, %c0_i32_0 : i32, i32
  }
  func.func @transform_12(%arg0: i32) -> (i32, i32) {
    %c0_i32 = arith.constant 0 : i32
    %c0_i32_0 = arith.constant 0 : i32
    %c0_i32_1 = arith.constant 0 : i32
    return %c0_i32, %c0_i32_0 : i32, i32
  }
  func.func @transform_13(%arg0: i32) -> (i32, i32) {
    %c0_i32 = arith.constant 0 : i32
    %c0_i32_0 = arith.constant 0 : i32
    return %c0_i32, %arg0 : i32, i32
  }
}

</mosaic_0001>

<bundles_post_ra>
// kernel: tpu_custom_call.1
= control target key start
LH: loop header
LB: loop body
LE: loop exit
PB: predicated region body
PF: predicated region fallthrough
CT: control target
= control target key end

     0   :  { %s1744_s0 = inlined_call_operand.vmem [shape: f32[256,6], index: 0, kind: input, shape index: {}]   ;;  %s1745_s1 = inlined_call_operand.vmem [shape: f32[256,16], index: 1, kind: input, shape index: {}]   ;;  %s1746_s2 = inlined_call_operand.vmem [shape: f32[16,6], index: 2, kind: input, shape index: {}]   ;;  %s1747_s3 = inlined_call_operand.vmem [shape: f32[16,1], index: 3, kind: input, shape index: {}]   ;;  %s1748_s4 = inlined_call_operand.vmem [shape: f32[48,16], index: 4, kind: input, shape index: {}]   ;;  %s1749_s5 = inlined_call_operand.vmem [shape: f32[48,1], index: 5, kind: input, shape index: {}]   ;;  %s1750_s6 = inlined_call_operand.vmem [shape: f32[48,16], index: 6, kind: input, shape index: {}]   ;;  %s1751_s7 = inlined_call_operand.vmem [shape: f32[48,48], index: 7, kind: input, shape index: {}]   ;;  %s1752_s8 = inlined_call_operand.vmem [shape: f32[48,1], index: 8, kind: input, shape index: {}]   ;;  %s1753_s9 = inlined_call_operand.vmem [shape: f32[48,48], index: 9, kind: input, shape index: {}]   ;;  %s1754_s10 = inlined_call_operand.vmem [shape: f32[48,1], index: 10, kind: input, shape index: {}]   ;;  %s1755_s11 = inlined_call_operand.vmem [shape: f32[1,48], index: 11, kind: input, shape index: {}]   ;;  %s1756_s12 = inlined_call_operand.<no memory space> [shape: f32[1,1], index: 12, kind: input, shape index: {}]   ;;  %s1757_s13 = inlined_call_operand.hbm [shape: f32[1,256], index: 13, kind: output, shape index: {}]  }
   0x1   :  { %v18_v0 = vstv %s1756_s12 }
   0x2   :  { %19 = vst [vmem:[#allocation2] sm:$0x1] %v18_v0 }
   0x3   :  { %v62_v1 = vld [vmem:[%s1744_s0 + $0x78] sm:$0xff]  ;;  %vm125_vm0 = vcmask 48128   ;;  %v61_v3 = vld [vmem:[%s1744_s0 + $0x70] sm:$0xff]  ;;  %v1215_v5 = vmov 0   ;;  %v114_v6 = vld [vmem:[%s1747_s3 + $0x8] sm:$0xff] }
   0x4   :  { %v78_v2 = vld [vmem:[%s1744_s0 + $0xf8] sm:$0xff]  ;;  %1066 = vmatpush.xpose.msk.msra.mxu0 %vm125_vm0, %v62_v1  ;;  %v77_v4 = vld [vmem:[%s1744_s0 + $0xf0] sm:$0xff]  ;;  %1186 = vset.pattern.permute.xlu0 %v1215_v5  ;;  %v60_v7 = vld [vmem:[%s1744_s0 + $0x68] sm:$0xff] }
   0x5   :  { %1084 = vmatpush.xpose.msk.msra.mxu1 %vm125_vm0, %v78_v2  ;;  %1187 = vset.pattern.permute.xlu1 %v1215_v5  ;;  %v76_v8 = vld [vmem:[%s1744_s0 + $0xe8] sm:$0xff] }
   0x6   :  { %1188 = vset.pattern.permute.xlu2 %v1215_v5  ;;  %122 = vperm.xlu0 %1186, %v114_v6  }
   0x8   :  { %1067 = vmatpush.xpose.msk.msra.mxu0 %vm125_vm0, %v61_v3 }
   0x9   :  { %1085 = vmatpush.xpose.msk.msra.mxu1 %vm125_vm0, %v77_v4 }
   0xa   :  { %20 = vsyncpa [#allocation4], 0  ;;  %v59_v9 = vld [vmem:[%s1744_s0 + $0x60] sm:$0xff]  ;;  %v58_v12 = vld [vmem:[%s1744_s0 + $0x58] sm:$0xff]  ;;  %vm298_vm1 = vcmask 130048  }
   0xb   :  { %v75_v10 = vld [vmem:[%s1744_s0 + $0xe0] sm:$0xff]  ;;  %v74_v13 = vld [vmem:[%s1744_s0 + $0xd8] sm:$0xff]  ;;  %v57_v14 = vld [vmem:[%s1744_s0 + $0x50] sm:$0xff] }
   0xc   :  { %1068 = vmatpush.xpose.msk.msra.mxu0 %vm125_vm0, %v60_v7  ;;  %v113_v11 = vld [vmem:[%s1747_s3] sm:$0xff]  ;;  %v73_v15 = vld [vmem:[%s1744_s0 + $0xd0] sm:$0xff]  ;;  %v572_v16 = vld [vmem:[%s1749_s5 + $0x8] sm:$0xff]  ;;  %s1216_s3 = smov [#allocation3]  }
   0xd   :  { %1086 = vmatpush.xpose.msk.msra.mxu1 %vm125_vm0, %v76_v8  ;;  %v56_v17 = vld [vmem:[%s1744_s0 + $0x48] sm:$0xff]  ;;  %v55_v19 = vld [vmem:[%s1744_s0 + $0x40] sm:$0xff]  ;;  %v54_v22 = vld [vmem:[%s1744_s0 + $0x38] sm:$0xff]  ;;  %s1055_s17 = sshll.u32 %s1216_s3, 4  ;;  %s1056_s17 = int_to_ptr.vmem [resolvable:$true] %s1055_s17 }
   0xe   :  { %117 = vperm.xlu0 %1186, %v113_v11   ;;  %v72_v18 = vld [vmem:[%s1744_s0 + $0xc8] sm:$0xff]  ;;  %v71_v20 = vld [vmem:[%s1744_s0 + $0xc0] sm:$0xff]  ;;  %v70_v23 = vld [vmem:[%s1744_s0 + $0xb8] sm:$0xff] }
   0xf   :  { %v665_v21 = vld [vmem:[%s1752_s8 + $0x20] sm:$0xff]  ;;  %v53_v24 = vld [vmem:[%s1744_s0 + $0x30] sm:$0xff]  ;;  %v662_v26 = vld [vmem:[%s1752_s8 + $0x8] sm:$0xff] }
  0x10   :  { %1069 = vmatpush.xpose.msk.msra.mxu0 %vm125_vm0, %v59_v9  ;;  %v69_v25 = vld [vmem:[%s1744_s0 + $0xb0] sm:$0xff]  ;;  %v52_v27 = vld [vmem:[%s1744_s0 + $0x28] sm:$0xff]  ;;  %v94_v29 = vld [vmem:[%s1745_s1 + $0x78] sm:$0xff] }
  0x11   :  { %1087 = vmatpush.xpose.msk.msra.mxu1 %vm125_vm0, %v75_v10  ;;  %v68_v28 = vld [vmem:[%s1744_s0 + $0xa8] sm:$0xff]  ;;  %v110_v30 = vld [vmem:[%s1745_s1 + $0xf8] sm:$0xff]  ;;  %v51_v31 = vld [vmem:[%s1744_s0 + $0x20] sm:$0xff]  ;;  %1102 = vmatpush.xpose.msk.msra.mxu2 %vm298_vm1, %v94_v29 }
  0x12   :  { %v67_v32 = vld [vmem:[%s1744_s0 + $0xa0] sm:$0xff]  ;;  %1124 = vmatpush.xpose.msk.msra.mxu3 %vm298_vm1, %v110_v30  ;;  %v93_v34 = vld [vmem:[%s1745_s1 + $0x70] sm:$0xff]  ;;  %v50_v36 = vld [vmem:[%s1744_s0 + $0x18] sm:$0xff] }
  0x13   :  { %v832_v33 = vld [vmem:[%s1754_s10 + $0x20] sm:$0xff]  ;;  %v109_v35 = vld [vmem:[%s1745_s1 + $0xf0] sm:$0xff]  ;;  %v66_v37 = vld [vmem:[%s1744_s0 + $0x98] sm:$0xff] }
  0x14   :  { %1070 = vmatpush.xpose.msk.msra.mxu0 %vm125_vm0, %v58_v12  ;;  %v49_v38 = vld [vmem:[%s1744_s0 + $0x10] sm:$0xff]  ;;  %v829_v40 = vld [vmem:[%s1754_s10 + $0x8] sm:$0xff]  ;;  %v47_v43 = vld [vmem:[%s1744_s0] sm:$0xff] }
  0x15   :  { %1088 = vmatpush.xpose.msk.msra.mxu1 %vm125_vm0, %v74_v13  ;;  %1103 = vmatpush.xpose.msk.msra.mxu2 %vm298_vm1, %v93_v34  ;;  %v65_v39 = vld [vmem:[%s1744_s0 + $0x90] sm:$0xff]  ;;  %v48_v41 = vld [vmem:[%s1744_s0 + $0x8] sm:$0xff]  ;;  %v63_v44 = vld [vmem:[%s1744_s0 + $0x80] sm:$0xff] }
  0x16   :  { %584 = vperm.xlu0 %1186, %v572_v16   ;;  %1125 = vmatpush.xpose.msk.msra.mxu3 %vm298_vm1, %v109_v35  ;;  %v64_v42 = vld [vmem:[%s1744_s0 + $0x88] sm:$0xff]  ;;  %v111_v45 = vld [vmem:[%s1746_s2] sm:$0xff]  ;;  %v90_v51 = vld [vmem:[%s1745_s1 + $0x58] sm:$0xff] }
  0x17   :  { %v112_v46 = vld [vmem:[%s1746_s2 + $0x8] sm:$0xff]  ;;  %v91_v49 = vld [vmem:[%s1745_s1 + $0x60] sm:$0xff]  ;;  %v106_v52 = vld [vmem:[%s1745_s1 + $0xd8] sm:$0xff] }
  0x18   :  { %1071 = vmatpush.xpose.msk.msra.mxu0 %vm125_vm0, %v57_v14  ;;  %v92_v47 = vld [vmem:[%s1745_s1 + $0x68] sm:$0xff]  ;;  %v107_v50 = vld [vmem:[%s1745_s1 + $0xe0] sm:$0xff]  ;;  %v89_v53 = vld [vmem:[%s1745_s1 + $0x50] sm:$0xff] }
  0x19   :  { %1089 = vmatpush.xpose.msk.msra.mxu1 %vm125_vm0, %v73_v15  ;;  %v108_v48 = vld [vmem:[%s1745_s1 + $0xe8] sm:$0xff]  ;;  %1104 = vmatpush.xpose.msk.msra.mxu2 %vm298_vm1, %v92_v47  ;;  %v105_v54 = vld [vmem:[%s1745_s1 + $0xd0] sm:$0xff]  ;;  %v87_v57 = vld [vmem:[%s1745_s1 + $0x40] sm:$0xff] }
  0x1a   :  { %1126 = vmatpush.xpose.msk.msra.mxu3 %vm298_vm1, %v108_v48  ;;  %v88_v55 = vld [vmem:[%s1745_s1 + $0x48] sm:$0xff]  ;;  %v103_v58 = vld [vmem:[%s1745_s1 + $0xc0] sm:$0xff]  ;;  %v86_v59 = vld [vmem:[%s1745_s1 + $0x38] sm:$0xff] }
  0x1b   :  { %v104_v56 = vld [vmem:[%s1745_s1 + $0xc8] sm:$0xff]  ;;  %v102_v60 = vld [vmem:[%s1745_s1 + $0xb8] sm:$0xff]  ;;  %v85_v61 = vld [vmem:[%s1745_s1 + $0x30] sm:$0xff] }
  0x1c   :  { %1072 = vmatpush.xpose.msk.msra.mxu0 %vm125_vm0, %v56_v17  ;;  %v101_v62 = vld [vmem:[%s1745_s1 + $0xb0] sm:$0xff]  ;;  %v84_v63 = vld [vmem:[%s1745_s1 + $0x28] sm:$0xff]  ;;  %v83_v1 = vld [vmem:[%s1745_s1 + $0x20] sm:$0xff] }
  0x1d   :  { %1090 = vmatpush.xpose.msk.msra.mxu1 %vm125_vm0, %v72_v18  ;;  %1105 = vmatpush.xpose.msk.msra.mxu2 %vm298_vm1, %v91_v49  ;;  %v100_v0 = vld [vmem:[%s1745_s1 + $0xa8] sm:$0xff]  ;;  %v99_v2 = vld [vmem:[%s1745_s1 + $0xa0] sm:$0xff]  ;;  %v82_v3 = vld [vmem:[%s1745_s1 + $0x18] sm:$0xff] }
  0x1e   :  { %689 = vperm.xlu0 %1186, %v665_v21   ;;  %1127 = vmatpush.xpose.msk.msra.mxu3 %vm298_vm1, %v107_v50  ;;  %v98_v4 = vld [vmem:[%s1745_s1 + $0x98] sm:$0xff]  ;;  %v81_v5 = vld [vmem:[%s1745_s1 + $0x10] sm:$0xff]  ;;  %v80_v7 = vld [vmem:[%s1745_s1 + $0x8] sm:$0xff] }
  0x1f   :  { %v97_v6 = vld [vmem:[%s1745_s1 + $0x90] sm:$0xff]  ;;  %v96_v8 = vld [vmem:[%s1745_s1 + $0x88] sm:$0xff]  ;;  %v79_v9 = vld [vmem:[%s1745_s1] sm:$0xff] }
  0x20   :  { %1073 = vmatpush.xpose.msk.msra.mxu0 %vm125_vm0, %v55_v19  ;;  %v95_v10 = vld [vmem:[%s1745_s1 + $0x80] sm:$0xff]  ;;  %v576_v12 = vld [vmem:[%s1749_s5 + $0x28] sm:$0xff]  ;;  %v294_v15 = vld [vmem:[%s1750_s6 + $0x10] sm:$0xff] }
  0x21   :  { %1091 = vmatpush.xpose.msk.msra.mxu1 %vm125_vm0, %v71_v20  ;;  %1106 = vmatpush.xpose.msk.msra.mxu2 %vm298_vm1, %v90_v51  ;;  %v292_v11 = vld [vmem:[%s1750_s6] sm:$0xff]  ;;  %v293_v13 = vld [vmem:[%s1750_s6 + $0x8] sm:$0xff]  ;;  %v295_v20 = vld [vmem:[%s1750_s6 + $0x18] sm:$0xff] }
  0x22   :  { %1128 = vmatpush.xpose.msk.msra.mxu3 %vm298_vm1, %v106_v52  ;;  %604 = vperm.xlu1 %1187, %v576_v12   ;;  %v575_v14 = vld [vmem:[%s1749_s5 + $0x20] sm:$0xff]  ;;  %v664_v21 = vld [vmem:[%s1752_s8 + $0x18] sm:$0xff]  ;;  %v288_v47 = vld [vmem:[%s1748_s4 + $0x10] sm:$0xff] }
  0x23   :  { %v571_v16 = vld [vmem:[%s1749_s5] sm:$0xff]  ;;  %v574_v30 = vld [vmem:[%s1749_s5 + $0x18] sm:$0xff]  ;;  %v663_v48 = vld [vmem:[%s1752_s8 + $0x10] sm:$0xff] }
  0x24   :  { %1074 = vmatpush.xpose.msk.msra.mxu0 %vm125_vm0, %v54_v22  ;;  %v296_v29 = vld [vmem:[%s1750_s6 + $0x20] sm:$0xff]  ;;  %594 = vperm.xlu2 %1188, %v574_v30   ;;  %v289_v49 = vld [vmem:[%s1748_s4 + $0x18] sm:$0xff]  ;;  %v833_v50 = vld [vmem:[%s1754_s10 + $0x28] sm:$0xff] }
  0x25   :  { %1092 = vmatpush.xpose.msk.msra.mxu1 %vm125_vm0, %v70_v23  ;;  %1107 = vmatpush.xpose.msk.msra.mxu2 %vm298_vm1, %v89_v53  ;;  %v290_v51 = vld [vmem:[%s1748_s4 + $0x20] sm:$0xff]  ;;  %v830_v52 = vld [vmem:[%s1754_s10 + $0x10] sm:$0xff]  ;;  %v291_v53 = vld [vmem:[%s1748_s4 + $0x28] sm:$0xff] }
  0x26   :  { %674 = vperm.xlu0 %1186, %v662_v26   ;;  %1129 = vmatpush.xpose.msk.msra.mxu3 %vm298_vm1, %v105_v54  ;;  %v989_v54 = vld [vmem:[#allocation2] sm:$0x1] }
  0x28   :  { %1075 = vmatpush.xpose.msk.msra.mxu0 %vm125_vm0, %v53_v24 }
  0x29   :  { %1093 = vmatpush.xpose.msk.msra.mxu1 %vm125_vm0, %v69_v25  ;;  %1108 = vmatpush.xpose.msk.msra.mxu2 %vm298_vm1, %v88_v55 }
  0x2a   :  { %1130 = vmatpush.xpose.msk.msra.mxu3 %vm298_vm1, %v104_v56  ;;  %599 = vperm.xlu1 %1187, %v575_v14  }
  0x2c   :  { %1076 = vmatpush.xpose.msk.msra.mxu0 %vm125_vm0, %v52_v27 }
  0x2d   :  { %1094 = vmatpush.xpose.msk.msra.mxu1 %vm125_vm0, %v68_v28  ;;  %1109 = vmatpush.xpose.msk.msra.mxu2 %vm298_vm1, %v87_v57 }
  0x2e   :  { %856 = vperm.xlu0 %1186, %v832_v33   ;;  %1131 = vmatpush.xpose.msk.msra.mxu3 %vm298_vm1, %v103_v58 }
  0x30   :  { %1077 = vmatpush.xpose.msk.msra.mxu0 %vm125_vm0, %v51_v31  ;;  %v661_v31 = vld [vmem:[%s1752_s8] sm:$0xff] }
  0x31   :  { %1095 = vmatpush.xpose.msk.msra.mxu1 %vm125_vm0, %v67_v32  ;;  %1110 = vmatpush.xpose.msk.msra.mxu2 %vm298_vm1, %v86_v59 }
  0x32   :  { %1132 = vmatpush.xpose.msk.msra.mxu3 %vm298_vm1, %v102_v60  ;;  %579 = vperm.xlu1 %1187, %v571_v16  }
  0x34   :  { %1078 = vmatpush.xpose.msk.msra.mxu0 %vm125_vm0, %v50_v36 }
  0x35   :  { %1096 = vmatpush.xpose.msk.msra.mxu1 %vm125_vm0, %v66_v37  ;;  %1111 = vmatpush.xpose.msk.msra.mxu2 %vm298_vm1, %v85_v61 }
  0x36   :  { %841 = vperm.xlu0 %1186, %v829_v40   ;;  %1133 = vmatpush.xpose.msk.msra.mxu3 %vm298_vm1, %v101_v62 }
  0x38   :  { %1079 = vmatpush.xpose.msk.msra.mxu0 %vm125_vm0, %v49_v38  ;;  %v286_v38 = vld [vmem:[%s1748_s4] sm:$0xff] }
  0x39   :  { %1097 = vmatpush.xpose.msk.msra.mxu1 %vm125_vm0, %v65_v39  ;;  %1112 = vmatpush.xpose.msk.msra.mxu2 %vm298_vm1, %v84_v63 }
  0x3a   :  { %1134 = vmatpush.xpose.msk.msra.mxu3 %vm298_vm1, %v100_v0  ;;  %684 = vperm.xlu1 %1187, %v664_v21  }
  0x3c   :  { %1080 = vmatpush.xpose.msk.msra.mxu0 %vm125_vm0, %v48_v41  ;;  %v297_v41 = vld [vmem:[%s1750_s6 + $0x28] sm:$0xff] }
  0x3d   :  { %1098 = vmatpush.xpose.msk.msra.mxu1 %vm125_vm0, %v64_v42  ;;  %1113 = vmatpush.xpose.msk.msra.mxu2 %vm298_vm1, %v83_v1  ;;  %v573_v42 = vld [vmem:[%s1749_s5 + $0x10] sm:$0xff] }
  0x3e   :  { %1135 = vmatpush.xpose.msk.msra.mxu3 %vm298_vm1, %v99_v2  ;;  %589 = vperm.xlu2 %1188, %v573_v42  }
  0x40   :  { %1081 = vmatpush.xpose.msk.msra.mxu0 %vm125_vm0, %v47_v43  ;;  %v831_v43 = vld [vmem:[%s1754_s10 + $0x18] sm:$0xff] }
  0x41   :  { %1099 = vmatpush.xpose.msk.msra.mxu1 %vm125_vm0, %v63_v44  ;;  %1114 = vmatpush.xpose.msk.msra.mxu2 %vm298_vm1, %v82_v3  ;;  %v287_v44 = vld [vmem:[%s1748_s4 + $0x8] sm:$0xff] }
  0x42   :  { %1136 = vmatpush.xpose.msk.msra.mxu3 %vm298_vm1, %v98_v4  ;;  %669 = vperm.xlu1 %1187, %v661_v31  }
  0x43   :  { %1082 = vmatmul.msk.f32.vlgmr.msra.gmra.mxu0 %vm125_vm0, %v111_v45 }
  0x44   :  { %1100 = vmatmul.msk.f32.vlgmr.msra.gmra.mxu1 %vm125_vm0, %v111_v45  ;;  %v666_v45 = vld [vmem:[%s1752_s8 + $0x28] sm:$0xff] }
  0x45   :  { %1115 = vmatpush.xpose.msk.msra.mxu2 %vm298_vm1, %v81_v5 }
  0x46   :  { %1137 = vmatpush.xpose.msk.msra.mxu3 %vm298_vm1, %v97_v6  ;;  %694 = vperm.xlu2 %1188, %v666_v45  }
  0x49   :  { %1116 = vmatpush.xpose.msk.msra.mxu2 %vm298_vm1, %v80_v7 }
  0x4a   :  { %1138 = vmatpush.xpose.msk.msra.mxu3 %vm298_vm1, %v96_v8  ;;  %851 = vperm.xlu1 %1187, %v831_v43  }
  0x4b   :  { %1083 = vmatmul.msk.f32.gmra.mxu0 %vm125_vm0, %v112_v46 }
  0x4c   :  { %1101 = vmatmul.msk.f32.gmra.mxu1 %vm125_vm0, %v112_v46  ;;  %v828_v46 = vld [vmem:[%s1754_s10] sm:$0xff] }
  0x4d   :  { %1117 = vmatpush.xpose.msk.msra.mxu2 %vm298_vm1, %v79_v9 }
  0x4e   :  { %1139 = vmatpush.xpose.msk.msra.mxu3 %vm298_vm1, %v95_v10  ;;  %679 = vperm.xlu2 %1188, %v663_v48  }
  0x50   :  { %1118 = vmatmul.msk.f32.vlgmr.msra.gmra.mxu2 %vm298_vm1, %v292_v11 }
  0x51   :  { %1140 = vmatmul.msk.f32.vlgmr.msra.gmra.mxu3 %vm298_vm1, %v292_v11 }
  0x52   :  { %836 = vperm.xlu1 %1187, %v828_v46  }
  0x56   :  { %861 = vperm.xlu2 %1188, %v833_v50  }
  0x58   :  { %1119 = vmatmul.msk.f32.gmra.mxu2 %vm298_vm1, %v293_v13 }
  0x59   :  { %1141 = vmatmul.msk.f32.gmra.mxu3 %vm298_vm1, %v293_v13 }
  0x5e   :  { %846 = vperm.xlu2 %1188, %v830_v52  }
  0x60   :  { %1120 = vmatmul.msk.f32.gmra.mxu2 %vm298_vm1, %v294_v15 }
  0x61   :  { %1142 = vmatmul.msk.f32.gmra.mxu3 %vm298_vm1, %v294_v15 }
  0x66   :  { %992 = vperm.xlu2 %1188, %v989_v54  }
  0x68   :  { %1121 = vmatmul.msk.f32.gmra.mxu2 %vm298_vm1, %v295_v20 }
  0x69   :  { %1143 = vmatmul.msk.f32.gmra.mxu3 %vm298_vm1, %v295_v20 }
  0x70   :  { %1122 = vmatmul.msk.f32.gmra.mxu2 %vm298_vm1, %v296_v29 }
  0x71   :  { %1144 = vmatmul.msk.f32.gmra.mxu3 %vm298_vm1, %v296_v29 }
  0x78   :  { %v123_v17 = vpop.permute.xlu0 %122  ;;  %1123 = vmatmul.msk.f32.gmra.mxu2 %vm298_vm1, %v297_v41 }
  0x79   :  { %1145 = vmatmul.msk.f32.gmra.mxu3 %vm298_vm1, %v297_v41 }
  0x7e   :  { %v595_v12 = vpop.permute.xlu2 %594 }
  0x80   :  { %v118_v22 = vpop.permute.xlu0 %117 }
  0x88   :  { %v585_v41 = vpop.permute.xlu0 %584 }
  0x94   :  { %v605_v7 = vpop.permute.xlu1 %604 }
  0x9c   :  { %v600_v13 = vpop.permute.xlu1 %599 }
  0xa4   :  { %v580_v42 = vpop.permute.xlu1 %579 }
  0xc0   :  { %v245_v18 = vpop.f32.mrf.mxu0 }
  0xc1   :  { %v268_v19 = vpop.f32.mrf.mxu1  ;;  %v246_v23 = vadd.f32 %v245_v18, %v118_v22 }
  0xc2   :  { %v269_v24 = vadd.f32 %v268_v19, %v118_v22 }
  0xc3   :  { %v278_v32 = vmul.f32 0.01, %v246_v23  ;;  %vm274_vm4 = vcmp.gt.f32.partialorder %v246_v23, 0.0 }
  0xc4   :  { %v279_v33 = vmul.f32 0.01, %v269_v24  ;;  %vm275_vm5 = vcmp.gt.f32.partialorder %v269_v24, 0.0 }
  0xc5   :  { %v282_v39 = vsel %vm274_vm4, %v246_v23, %v278_v32  ;;  %v590_v32 = vpop.permute.xlu2 %589 }
  0xc6   :  { %v283_v40 = vsel %vm275_vm5, %v269_v24, %v279_v33 }
  0xc8   :  { %v248_v25 = vpop.f32.mrf.mxu0 }
  0xc9   :  { %v271_v26 = vpop.f32.mrf.mxu1  ;;  %v249_v27 = vadd.f32 %v248_v25, %v123_v17 }
  0xca   :  { %v272_v28 = vadd.f32 %v271_v26, %v123_v17 }
  0xcb   :  { %vm276_vm2 = vcmp.gt.f32.partialorder %v249_v27, 0.0  ;;  %v280_v34 = vmul.f32 0.01, %v249_v27 }
  0xcc   :  { %vm277_vm3 = vcmp.gt.f32.partialorder %v272_v28, 0.0  ;;  %v281_v35 = vmul.f32 0.01, %v272_v28 }
  0xcd   :  { %v284_v36 = vsel %vm276_vm2, %v249_v27, %v280_v34  ;;  %vm697_vm2 = vcmask 392192  }
  0xce   :  { %v285_v37 = vsel %vm277_vm3, %v272_v28, %v281_v35  ;;  %515 = vmatpush.msrb.mxu0 %v284_v36 }
  0xcf   :  { %550 = vmatpush.msrb.mxu1 %v285_v37 }
  0xd0   :  { %516 = vmatpush.msrb.mxu0 %v282_v39 }
  0xd1   :  { %551 = vmatpush.msrb.mxu1 %v283_v40  ;;  %1146 = vmatmul.msk.f32.vlgmr.msrb.gmra.mxu0 %vm298_vm1, %v286_v38 }
  0xd2   :  { %1152 = vmatmul.msk.f32.vlgmr.msrb.gmra.mxu1 %vm298_vm1, %v286_v38 }
  0xd3   :  { %v430_v55 = vpop.f32.mrf.mxu2 }
  0xd4   :  { %v465_v56 = vpop.f32.mrf.mxu3 }
  0xd9   :  { %1147 = vmatmul.msk.f32.gmra.mxu0 %vm298_vm1, %v287_v44 }
  0xda   :  { %1153 = vmatmul.msk.f32.gmra.mxu1 %vm298_vm1, %v287_v44 }
  0xdb   :  { %v433_v57 = vpop.f32.mrf.mxu2 }
  0xdc   :  { %v468_v58 = vpop.f32.mrf.mxu3 }
  0xe1   :  { %1148 = vmatmul.msk.f32.gmra.mxu0 %vm298_vm1, %v288_v47 }
  0xe2   :  { %1154 = vmatmul.msk.f32.gmra.mxu1 %vm298_vm1, %v288_v47 }
  0xe3   :  { %v436_v61 = vpop.f32.mrf.mxu2 }
  0xe4   :  { %v471_v62 = vpop.f32.mrf.mxu3 }
  0xe9   :  { %1149 = vmatmul.msk.f32.gmra.mxu0 %vm298_vm1, %v289_v49 }
  0xea   :  { %1155 = vmatmul.msk.f32.gmra.mxu1 %vm298_vm1, %v289_v49 }
  0xeb   :  { %v439_v3 = vpop.f32.mrf.mxu2 }
  0xec   :  { %v474_v4 = vpop.f32.mrf.mxu3 }
  0xf1   :  { %1150 = vmatmul.msk.f32.gmra.mxu0 %vm298_vm1, %v290_v51 }
  0xf2   :  { %1156 = vmatmul.msk.f32.gmra.mxu1 %vm298_vm1, %v290_v51 }
  0xf3   :  { %v442_v8 = vpop.f32.mrf.mxu2 }
  0xf4   :  { %v477_v9 = vpop.f32.mrf.mxu3 }
  0xf9   :  { %1151 = vmatmul.msk.f32.gmra.mxu0 %vm298_vm1, %v291_v53 }
  0xfa   :  { %1157 = vmatmul.msk.f32.gmra.mxu1 %vm298_vm1, %v291_v53 }
  0xfb   :  { %v445_v16 = vpop.f32.mrf.mxu2 }
  0xfc   :  { %v480_v17 = vpop.f32.mrf.mxu3 }
 0x14e   :  { %v518_v59 = vpop.f32.mrf.mxu0 }
 0x14f   :  { %v553_v60 = vpop.f32.mrf.mxu1  ;;  %v519_v28 = vadd.f32 %v518_v59, %v430_v55 }
 0x150   :  { %v554_v29 = vadd.f32 %v553_v60, %v465_v56 }
 0x151   :  { %v607_v51 = vadd.f32 %v580_v42, %v519_v28 }
 0x152   :  { %v608_v52 = vadd.f32 %v580_v42, %v554_v29 }
 0x153   :  { %vm619_vm0 = vcmp.gt.f32.partialorder %v607_v51, 0.0 }
 0x154   :  { %vm620_vm1 = vcmp.gt.f32.partialorder %v608_v52, 0.0 }
 0x156   :  { %v521_v63 = vpop.f32.mrf.mxu0 }
 0x157   :  { %v556_v0 = vpop.f32.mrf.mxu1  ;;  %v522_v30 = vadd.f32 %v521_v63, %v433_v57  ;;  %v631_v63 = vmul.f32 0.01, %v607_v51 }
 0x158   :  { %v557_v31 = vadd.f32 %v556_v0, %v468_v58  ;;  %v632_v0 = vmul.f32 0.01, %v608_v52 }
 0x159   :  { %v609_v45 = vadd.f32 %v585_v41, %v522_v30 }
 0x15a   :  { %v610_v46 = vadd.f32 %v585_v41, %v557_v31 }
 0x15b   :  { %v633_v59 = vmul.f32 0.01, %v609_v45  ;;  %vm621_vm14 = vcmp.gt.f32.partialorder %v609_v45, 0.0 }
 0x15c   :  { %v634_v60 = vmul.f32 0.01, %v610_v46  ;;  %vm622_vm15 = vcmp.gt.f32.partialorder %v610_v46, 0.0 }
 0x15e   :  { %v524_v1 = vpop.f32.mrf.mxu0 }
 0x15f   :  { %v559_v2 = vpop.f32.mrf.mxu1  ;;  %v525_v20 = vadd.f32 %v524_v1, %v436_v61  ;;  %v645_v1 = vsel %vm621_vm14, %v609_v45, %v633_v59 }
 0x160   :  { %v560_v21 = vadd.f32 %v559_v2, %v471_v62  ;;  %v646_v2 = vsel %vm622_vm15, %v610_v46, %v634_v60 }
 0x161   :  { %v611_v37 = vadd.f32 %v590_v32, %v525_v20 }
 0x162   :  { %v612_v38 = vadd.f32 %v590_v32, %v560_v21 }
 0x163   :  { %v635_v55 = vmul.f32 0.01, %v611_v37  ;;  %vm623_vm12 = vcmp.gt.f32.partialorder %v611_v37, 0.0 }
 0x164   :  { %v636_v56 = vmul.f32 0.01, %v612_v38  ;;  %vm624_vm13 = vcmp.gt.f32.partialorder %v612_v38, 0.0 }
 0x165   :  { %v647_v61 = vsel %vm623_vm12, %v611_v37, %v635_v55 }
 0x166   :  { %v527_v5 = vpop.f32.mrf.mxu0  ;;  %v648_v62 = vsel %vm624_vm13, %v612_v38, %v636_v56 }
 0x167   :  { %v562_v6 = vpop.f32.mrf.mxu1  ;;  %v528_v18 = vadd.f32 %v527_v5, %v439_v3  ;;  %v655_v3 = vld [vmem:[%s1751_s7] sm:$0xff]  ;;  %v644_v5 = vsel %vm620_vm1, %v608_v52, %v632_v0 }
 0x168   :  { %v563_v19 = vadd.f32 %v562_v6, %v474_v4  ;;  %v643_v4 = vsel %vm619_vm0, %v607_v51, %v631_v63  ;;  %v656_v6 = vld [vmem:[%s1751_s7 + $0x8] sm:$0xff]  ;;  %v822_v63 = vld [vmem:[%s1753_s9] sm:$0xff] }
 0x169   :  { %v613_v33 = vadd.f32 %v595_v12, %v528_v18 }
 0x16a   :  { %v614_v34 = vadd.f32 %v595_v12, %v563_v19  ;;  %v695_v19 = vpop.permute.xlu2 %694 }
 0x16b   :  { %v637_v49 = vmul.f32 0.01, %v613_v33  ;;  %vm625_vm10 = vcmp.gt.f32.partialorder %v613_v33, 0.0 }
 0x16c   :  { %v638_v50 = vmul.f32 0.01, %v614_v34  ;;  %vm626_vm11 = vcmp.gt.f32.partialorder %v614_v34, 0.0 }
 0x16d   :  { %v649_v57 = vsel %vm625_vm10, %v613_v33, %v637_v49 }
 0x16e   :  { %v530_v10 = vpop.f32.mrf.mxu0  ;;  %v650_v58 = vsel %vm626_vm11, %v614_v34, %v638_v50 }
 0x16f   :  { %v565_v11 = vpop.f32.mrf.mxu1  ;;  %v531_v14 = vadd.f32 %v530_v10, %v442_v8  ;;  %v658_v8 = vld [vmem:[%s1751_s7 + $0x18] sm:$0xff]  ;;  %v660_v10 = vld [vmem:[%s1751_s7 + $0x28] sm:$0xff] }
 0x170   :  { %v566_v15 = vadd.f32 %v565_v11, %v477_v9  ;;  %v659_v9 = vld [vmem:[%s1751_s7 + $0x20] sm:$0xff] }
 0x171   :  { %v615_v22 = vadd.f32 %v600_v13, %v531_v14 }
 0x172   :  { %v616_v23 = vadd.f32 %v600_v13, %v566_v15  ;;  %v680_v28 = vpop.permute.xlu2 %679 }
 0x173   :  { %v639_v39 = vmul.f32 0.01, %v615_v22  ;;  %vm627_vm8 = vcmp.gt.f32.partialorder %v615_v22, 0.0 }
 0x174   :  { %v640_v40 = vmul.f32 0.01, %v616_v23  ;;  %vm628_vm9 = vcmp.gt.f32.partialorder %v616_v23, 0.0 }
 0x175   :  { %v651_v53 = vsel %vm627_vm8, %v615_v22, %v639_v39  ;;  %v690_v22 = vpop.permute.xlu0 %689 }
 0x176   :  { %v533_v24 = vpop.f32.mrf.mxu0  ;;  %v652_v54 = vsel %vm628_vm9, %v616_v23, %v640_v40  ;;  %v685_v23 = vpop.permute.xlu1 %684 }
 0x177   :  { %v568_v25 = vpop.f32.mrf.mxu1  ;;  %v534_v26 = vadd.f32 %v533_v24, %v445_v16 }
 0x178   :  { %v569_v27 = vadd.f32 %v568_v25, %v480_v17 }
 0x179   :  { %v617_v35 = vadd.f32 %v605_v7, %v534_v26 }
 0x17a   :  { %v618_v36 = vadd.f32 %v605_v7, %v569_v27  ;;  %v657_v7 = vld [vmem:[%s1751_s7 + $0x10] sm:$0xff] }
 0x17b   :  { %vm629_vm6 = vcmp.gt.f32.partialorder %v617_v35, 0.0  ;;  %v641_v43 = vmul.f32 0.01, %v617_v35 }
 0x17c   :  { %vm630_vm7 = vcmp.gt.f32.partialorder %v618_v36, 0.0  ;;  %v642_v44 = vmul.f32 0.01, %v618_v36 }
 0x17d   :  { %v653_v47 = vsel %vm629_vm6, %v617_v35, %v641_v43  ;;  %v675_v37 = vpop.permute.xlu0 %674 }
 0x17e   :  { %v654_v48 = vsel %vm630_vm7, %v618_v36, %v642_v44  ;;  %726 = vmatpush.msrb.mxu2 %v653_v47  ;;  %v670_v42 = vpop.permute.xlu1 %669 }
 0x17f   :  { %761 = vmatpush.msrb.mxu3 %v654_v48 }
 0x180   :  { %727 = vmatpush.msrb.mxu2 %v651_v53 }
 0x181   :  { %762 = vmatpush.msrb.mxu3 %v652_v54 }
 0x182   :  { %728 = vmatpush.msrb.mxu2 %v649_v57 }
 0x183   :  { %763 = vmatpush.msrb.mxu3 %v650_v58 }
 0x184   :  { %729 = vmatpush.msrb.mxu2 %v647_v61 }
 0x185   :  { %764 = vmatpush.msrb.mxu3 %v648_v62 }
 0x186   :  { %730 = vmatpush.msrb.mxu2 %v645_v1 }
 0x187   :  { %765 = vmatpush.msrb.mxu3 %v646_v2  ;;  %v823_v2 = vld [vmem:[%s1753_s9 + $0x8] sm:$0xff] }
 0x188   :  { %731 = vmatpush.msrb.mxu2 %v643_v4  ;;  %v825_v4 = vld [vmem:[%s1753_s9 + $0x18] sm:$0xff] }
 0x189   :  { %766 = vmatpush.msrb.mxu3 %v644_v5  ;;  %1158 = vmatmul.msk.f32.vlgmr.msrb.gmra.mxu2 %vm697_vm2, %v655_v3  ;;  %v826_v5 = vld [vmem:[%s1753_s9 + $0x20] sm:$0xff] }
 0x18a   :  { %1164 = vmatmul.msk.f32.vlgmr.msrb.gmra.mxu3 %vm697_vm2, %v655_v3  ;;  %v824_v3 = vld [vmem:[%s1753_s9 + $0x10] sm:$0xff] }
 0x191   :  { %1159 = vmatmul.msk.f32.gmra.mxu2 %vm697_vm2, %v656_v6 }
 0x192   :  { %1165 = vmatmul.msk.f32.gmra.mxu3 %vm697_vm2, %v656_v6  ;;  %v827_v6 = vld [vmem:[%s1753_s9 + $0x28] sm:$0xff] }
 0x199   :  { %1160 = vmatmul.msk.f32.gmra.mxu2 %vm697_vm2, %v657_v7 }
 0x19a   :  { %1166 = vmatmul.msk.f32.gmra.mxu3 %vm697_vm2, %v657_v7 }
 0x1a1   :  { %1161 = vmatmul.msk.f32.gmra.mxu2 %vm697_vm2, %v658_v8 }
 0x1a2   :  { %1167 = vmatmul.msk.f32.gmra.mxu3 %vm697_vm2, %v658_v8 }
 0x1a9   :  { %1162 = vmatmul.msk.f32.gmra.mxu2 %vm697_vm2, %v659_v9 }
 0x1aa   :  { %1168 = vmatmul.msk.f32.gmra.mxu3 %vm697_vm2, %v659_v9 }
 0x1b1   :  { %1163 = vmatmul.msk.f32.gmra.mxu2 %vm697_vm2, %v660_v10 }
 0x1b2   :  { %1169 = vmatmul.msk.f32.gmra.mxu3 %vm697_vm2, %v660_v10 }
 0x20c   :  { %v733_v11 = vpop.f32.mrf.mxu2 }
 0x20d   :  { %v768_v12 = vpop.f32.mrf.mxu3  ;;  %v734_v47 = vadd.f32 %v733_v11, %v670_v42 }
 0x20e   :  { %v769_v48 = vadd.f32 %v768_v12, %v670_v42 }
 0x20f   :  { %v798_v57 = vmul.f32 0.01, %v734_v47  ;;  %vm786_vm13 = vcmp.gt.f32.partialorder %v734_v47, 0.0 }
 0x210   :  { %v799_v58 = vmul.f32 0.01, %v769_v48  ;;  %vm787_vm14 = vcmp.gt.f32.partialorder %v769_v48, 0.0 }
 0x211   :  { %v810_v0 = vsel %vm786_vm13, %v734_v47, %v798_v57 }
 0x212   :  { %v811_v1 = vsel %vm787_vm14, %v769_v48, %v799_v58 }
 0x214   :  { %v736_v13 = vpop.f32.mrf.mxu2 }
 0x215   :  { %v771_v14 = vpop.f32.mrf.mxu3  ;;  %v737_v40 = vadd.f32 %v736_v13, %v675_v37 }
 0x216   :  { %v772_v41 = vadd.f32 %v771_v14, %v675_v37 }
 0x217   :  { %v800_v53 = vmul.f32 0.01, %v737_v40  ;;  %vm788_vm11 = vcmp.gt.f32.partialorder %v737_v40, 0.0 }
 0x218   :  { %v801_v54 = vmul.f32 0.01, %v772_v41  ;;  %vm789_vm12 = vcmp.gt.f32.partialorder %v772_v41, 0.0 }
 0x219   :  { %v812_v61 = vsel %vm788_vm11, %v737_v40, %v800_v53 }
 0x21a   :  { %v813_v62 = vsel %vm789_vm12, %v772_v41, %v801_v54  ;;  %vm1042_vm12 = vcmask 1040384  }
 0x21c   :  { %v739_v15 = vpop.f32.mrf.mxu2 }
 0x21d   :  { %v774_v16 = vpop.f32.mrf.mxu3  ;;  %v740_v33 = vadd.f32 %v739_v15, %v680_v28  ;;  %v862_v15 = vpop.permute.xlu2 %861 }
 0x21e   :  { %v775_v34 = vadd.f32 %v774_v16, %v680_v28 }
 0x21f   :  { %v802_v49 = vmul.f32 0.01, %v740_v33  ;;  %vm790_vm9 = vcmp.gt.f32.partialorder %v740_v33, 0.0 }
 0x220   :  { %v803_v50 = vmul.f32 0.01, %v775_v34  ;;  %vm791_vm10 = vcmp.gt.f32.partialorder %v775_v34, 0.0 }
 0x221   :  { %v814_v59 = vsel %vm790_vm9, %v740_v33, %v802_v49 }
 0x222   :  { %v815_v60 = vsel %vm791_vm10, %v775_v34, %v803_v50 }
 0x224   :  { %v742_v17 = vpop.f32.mrf.mxu2 }
 0x225   :  { %v777_v18 = vpop.f32.mrf.mxu3  ;;  %v743_v29 = vadd.f32 %v742_v17, %v685_v23 }
 0x226   :  { %v778_v30 = vadd.f32 %v777_v18, %v685_v23  ;;  %v857_v18 = vpop.permute.xlu0 %856 }
 0x227   :  { %v804_v43 = vmul.f32 0.01, %v743_v29  ;;  %vm792_vm7 = vcmp.gt.f32.partialorder %v743_v29, 0.0 }
 0x228   :  { %v805_v44 = vmul.f32 0.01, %v778_v30  ;;  %vm793_vm8 = vcmp.gt.f32.partialorder %v778_v30, 0.0 }
 0x229   :  { %v816_v55 = vsel %vm792_vm7, %v743_v29, %v804_v43 }
 0x22a   :  { %v817_v56 = vsel %vm793_vm8, %v778_v30, %v805_v44 }
 0x22c   :  { %v745_v20 = vpop.f32.mrf.mxu2 }
 0x22d   :  { %v780_v21 = vpop.f32.mrf.mxu3  ;;  %v746_v24 = vadd.f32 %v745_v20, %v690_v22 }
 0x22e   :  { %v781_v25 = vadd.f32 %v780_v21, %v690_v22  ;;  %v842_v33 = vpop.permute.xlu0 %841 }
 0x22f   :  { %v806_v35 = vmul.f32 0.01, %v746_v24  ;;  %vm794_vm5 = vcmp.gt.f32.partialorder %v746_v24, 0.0 }
 0x230   :  { %v807_v36 = vmul.f32 0.01, %v781_v25  ;;  %vm795_vm6 = vcmp.gt.f32.partialorder %v781_v25, 0.0 }
 0x231   :  { %v818_v51 = vsel %vm794_vm5, %v746_v24, %v806_v35  ;;  %v847_v24 = vpop.permute.xlu2 %846 }
 0x232   :  { %v819_v52 = vsel %vm795_vm6, %v781_v25, %v807_v36 }
 0x234   :  { %v748_v26 = vpop.f32.mrf.mxu2 }
 0x235   :  { %v783_v27 = vpop.f32.mrf.mxu3  ;;  %v749_v31 = vadd.f32 %v748_v26, %v695_v19 }
 0x236   :  { %v784_v32 = vadd.f32 %v783_v27, %v695_v19  ;;  %v852_v19 = vpop.permute.xlu1 %851 }
 0x237   :  { %vm796_vm3 = vcmp.gt.f32.partialorder %v749_v31, 0.0  ;;  %v808_v38 = vmul.f32 0.01, %v749_v31 }
 0x238   :  { %vm797_vm4 = vcmp.gt.f32.partialorder %v784_v32, 0.0  ;;  %v809_v39 = vmul.f32 0.01, %v784_v32 }
 0x239   :  { %v820_v45 = vsel %vm796_vm3, %v749_v31, %v808_v38 }
 0x23a   :  { %v821_v46 = vsel %vm797_vm4, %v784_v32, %v809_v39  ;;  %892 = vmatpush.msra.mxu0 %v820_v45 }
 0x23b   :  { %927 = vmatpush.msra.mxu1 %v821_v46 }
 0x23c   :  { %893 = vmatpush.msra.mxu0 %v818_v51 }
 0x23d   :  { %928 = vmatpush.msra.mxu1 %v819_v52 }
 0x23e   :  { %894 = vmatpush.msra.mxu0 %v816_v55  ;;  %v837_v38 = vpop.permute.xlu1 %836 }
 0x23f   :  { %929 = vmatpush.msra.mxu1 %v817_v56 }
 0x240   :  { %895 = vmatpush.msra.mxu0 %v814_v59  ;;  %v988_v59 = vld [vmem:[%s1755_s11] sm:$0x1]  ;;  %s1057_s11 = sshll.u32 %s1757_s13, 4  ;;  %s1058_s11 = int_to_ptr.hbm [resolvable:$true] %s1057_s11 }
 0x241   :  { %930 = vmatpush.msra.mxu1 %v815_v60 }
 0x242   :  { %896 = vmatpush.msra.mxu0 %v812_v61 }
 0x243   :  { %931 = vmatpush.msra.mxu1 %v813_v62  ;;  %v993_v62 = vpop.permute.xlu2 %992 }
 0x244   :  { %897 = vmatpush.msra.mxu0 %v810_v0  ;;  %v1045_v0 = vlaneseq }
 0x245   :  { %932 = vmatpush.msra.mxu1 %v811_v1  ;;  %1170 = vmatmul.msk.f32.vlgmr.msra.gmra.mxu0 %vm697_vm2, %v822_v63 }
 0x246   :  { %1176 = vmatmul.msk.f32.vlgmr.msra.gmra.mxu1 %vm697_vm2, %v822_v63  ;;  %v995_v63 = vperm.slane %v993_v62, 0  ;;  %vm1047_vm13 = vcmp.lt.s32.totalorder %v1045_v0, 256 }
 0x24d   :  { %1171 = vmatmul.msk.f32.gmra.mxu0 %vm697_vm2, %v823_v2 }
 0x24e   :  { %1177 = vmatmul.msk.f32.gmra.mxu1 %vm697_vm2, %v823_v2 }
 0x255   :  { %1172 = vmatmul.msk.f32.gmra.mxu0 %vm697_vm2, %v824_v3 }
 0x256   :  { %1178 = vmatmul.msk.f32.gmra.mxu1 %vm697_vm2, %v824_v3 }
 0x25d   :  { %1173 = vmatmul.msk.f32.gmra.mxu0 %vm697_vm2, %v825_v4 }
 0x25e   :  { %1179 = vmatmul.msk.f32.gmra.mxu1 %vm697_vm2, %v825_v4 }
 0x265   :  { %1174 = vmatmul.msk.f32.gmra.mxu0 %vm697_vm2, %v826_v5 }
 0x266   :  { %1180 = vmatmul.msk.f32.gmra.mxu1 %vm697_vm2, %v826_v5 }
 0x26d   :  { %1175 = vmatmul.msk.f32.gmra.mxu0 %vm697_vm2, %v827_v6 }
 0x26e   :  { %1181 = vmatmul.msk.f32.gmra.mxu1 %vm697_vm2, %v827_v6 }
 0x2c2   :  { %v899_v7 = vpop.f32.mrf.mxu0 }
 0x2c3   :  { %v934_v8 = vpop.f32.mrf.mxu1  ;;  %v900_v43 = vadd.f32 %v899_v7, %v837_v38 }
 0x2c4   :  { %v935_v44 = vadd.f32 %v934_v8, %v837_v38 }
 0x2c5   :  { %v964_v53 = vmul.f32 0.01, %v900_v43  ;;  %vm952_vm10 = vcmp.gt.f32.partialorder %v900_v43, 0.0 }
 0x2c6   :  { %v965_v54 = vmul.f32 0.01, %v935_v44  ;;  %vm953_vm11 = vcmp.gt.f32.partialorder %v935_v44, 0.0 }
 0x2c7   :  { %v976_v60 = vsel %vm952_vm10, %v900_v43, %v964_v53 }
 0x2c8   :  { %v977_v61 = vsel %vm953_vm11, %v935_v44, %v965_v54 }
 0x2ca   :  { %v902_v9 = vpop.f32.mrf.mxu0 }
 0x2cb   :  { %v937_v10 = vpop.f32.mrf.mxu1  ;;  %v903_v36 = vadd.f32 %v902_v9, %v842_v33 }
 0x2cc   :  { %v938_v37 = vadd.f32 %v937_v10, %v842_v33 }
 0x2cd   :  { %v966_v49 = vmul.f32 0.01, %v903_v36  ;;  %vm954_vm8 = vcmp.gt.f32.partialorder %v903_v36, 0.0 }
 0x2ce   :  { %v967_v50 = vmul.f32 0.01, %v938_v37  ;;  %vm955_vm9 = vcmp.gt.f32.partialorder %v938_v37, 0.0 }
 0x2cf   :  { %v978_v57 = vsel %vm954_vm8, %v903_v36, %v966_v49 }
 0x2d0   :  { %v979_v58 = vsel %vm955_vm9, %v938_v37, %v967_v50 }
 0x2d2   :  { %v905_v11 = vpop.f32.mrf.mxu0 }
 0x2d3   :  { %v940_v12 = vpop.f32.mrf.mxu1  ;;  %v906_v29 = vadd.f32 %v905_v11, %v847_v24 }
 0x2d4   :  { %v941_v30 = vadd.f32 %v940_v12, %v847_v24 }
 0x2d5   :  { %v968_v45 = vmul.f32 0.01, %v906_v29  ;;  %vm956_vm6 = vcmp.gt.f32.partialorder %v906_v29, 0.0 }
 0x2d6   :  { %v969_v46 = vmul.f32 0.01, %v941_v30  ;;  %vm957_vm7 = vcmp.gt.f32.partialorder %v941_v30, 0.0 }
 0x2d7   :  { %v980_v55 = vsel %vm956_vm6, %v906_v29, %v968_v45 }
 0x2d8   :  { %v981_v56 = vsel %vm957_vm7, %v941_v30, %v969_v46 }
 0x2da   :  { %v908_v13 = vpop.f32.mrf.mxu0 }
 0x2db   :  { %v943_v14 = vpop.f32.mrf.mxu1  ;;  %v909_v25 = vadd.f32 %v908_v13, %v852_v19 }
 0x2dc   :  { %v944_v26 = vadd.f32 %v943_v14, %v852_v19 }
 0x2dd   :  { %v970_v39 = vmul.f32 0.01, %v909_v25  ;;  %vm958_vm4 = vcmp.gt.f32.partialorder %v909_v25, 0.0 }
 0x2de   :  { %v971_v40 = vmul.f32 0.01, %v944_v26  ;;  %vm959_vm5 = vcmp.gt.f32.partialorder %v944_v26, 0.0 }
 0x2df   :  { %v982_v51 = vsel %vm958_vm4, %v909_v25, %v970_v39 }
 0x2e0   :  { %v983_v52 = vsel %vm959_vm5, %v944_v26, %v971_v40 }
 0x2e2   :  { %v911_v16 = vpop.f32.mrf.mxu0 }
 0x2e3   :  { %v946_v17 = vpop.f32.mrf.mxu1  ;;  %v912_v20 = vadd.f32 %v911_v16, %v857_v18 }
 0x2e4   :  { %v947_v21 = vadd.f32 %v946_v17, %v857_v18 }
 0x2e5   :  { %v972_v31 = vmul.f32 0.01, %v912_v20  ;;  %vm960_vm1 = vcmp.gt.f32.partialorder %v912_v20, 0.0 }
 0x2e6   :  { %v973_v32 = vmul.f32 0.01, %v947_v21  ;;  %vm961_vm3 = vcmp.gt.f32.partialorder %v947_v21, 0.0 }
 0x2e7   :  { %v984_v47 = vsel %vm960_vm1, %v912_v20, %v972_v31 }
 0x2e8   :  { %v985_v48 = vsel %vm961_vm3, %v947_v21, %v973_v32 }
 0x2ea   :  { %v914_v22 = vpop.f32.mrf.mxu0 }
 0x2eb   :  { %v949_v23 = vpop.f32.mrf.mxu1  ;;  %v915_v27 = vadd.f32 %v914_v22, %v862_v15 }
 0x2ec   :  { %v950_v28 = vadd.f32 %v949_v23, %v862_v15 }
 0x2ed   :  { %vm962_vm15 = vcmp.gt.f32.partialorder %v915_v27, 0.0  ;;  %v974_v34 = vmul.f32 0.01, %v915_v27 }
 0x2ee   :  { %vm963_vm0 = vcmp.gt.f32.partialorder %v950_v28, 0.0  ;;  %v975_v35 = vmul.f32 0.01, %v950_v28 }
 0x2ef   :  { %v986_v41 = vsel %vm962_vm15, %v915_v27, %v974_v34 }
 0x2f0   :  { %v987_v42 = vsel %vm963_vm0, %v950_v28, %v975_v35  ;;  %1009 = vmatpush.msra.mxu2 %v986_v41 }
 0x2f1   :  { %1029 = vmatpush.msra.mxu3 %v987_v42 }
 0x2f2   :  { %1010 = vmatpush.msra.mxu2 %v984_v47 }
 0x2f3   :  { %1030 = vmatpush.msra.mxu3 %v985_v48 }
 0x2f4   :  { %1011 = vmatpush.msra.mxu2 %v982_v51 }
 0x2f5   :  { %1031 = vmatpush.msra.mxu3 %v983_v52 }
 0x2f6   :  { %1012 = vmatpush.msra.mxu2 %v980_v55 }
 0x2f7   :  { %1032 = vmatpush.msra.mxu3 %v981_v56 }
 0x2f8   :  { %1013 = vmatpush.msra.mxu2 %v978_v57 }
 0x2f9   :  { %1033 = vmatpush.msra.mxu3 %v979_v58 }
 0x2fa   :  { %1014 = vmatpush.msra.mxu2 %v976_v60 }
 0x2fb   :  { %1034 = vmatpush.msra.mxu3 %v977_v61  ;;  %1182 = vmatmul.msk.f32.vlgmr.msra.gmra.mxu2 %vm697_vm2, %v988_v59 }
 0x2fc   :  { %1183 = vmatmul.msk.f32.vlgmr.msra.gmra.mxu3 %vm697_vm2, %v988_v59 }
 0x37e   :  { %v1016_v1 = vpop.f32.mrf.mxu2 }
 0x37f   :  { %v1036_v2 = vpop.f32.mrf.mxu3  ;;  %v1017_v4 = vadd.f32 %v1016_v1, %v995_v63 }
 0x380   :  { %v1037_v3 = vadd.f32 %v1036_v2, %v995_v63 }
 0x382   :  { %v1041_v5 = vrot.slane %v1037_v3, 7 }
 0x384   :  { %v1043_v6 = vsel %vm1042_vm12, %v1017_v4, %v1041_v5 }
 0x385   :  { %1049 = vst.msk [vmem:[#allocation3] sm:$0x3] %vm1047_vm13, %v1043_v6 }
 0x386   :  { %1060 = dma.vmem_to_hbm [thread:$0]  %s1056_s17, 32, %s1058_s11, [#allocation4]  }
 0x387   :  { %1213 = dma.done.wait [#allocation4], 32  }
 0x388   :  { %1214 = vsyncadd [#allocation4], 4294967264 }
 0x389   :  { %1065 = vsyncpa [#allocation4], 1 }

</bundles_post_ra>
